<compile_context>
chip_gen: v5e
topology: v5e:2x2
jax: 0.10.0
libtpu: 0.0.40
codegen_flags: <defaults>
</compile_context>

<pallas_src>
import jax
import jax.numpy as jnp
from jax.experimental import pallas as pl
from jax.experimental.pallas import tpu as pltpu


_BLOCK_BYTES = 4 * 1024 * 1024        # ~4 MiB per block
_MIN_PALLAS_BYTES = 256 * 1024        # below this, plain jnp multiply wins
_VMEM_LIMIT_BYTES = 32 * 1024 * 1024  # safe on v5e/v6e/v7x


def _cdiv(a, b):
    return -(-a // b)


def _make_const_scale_kernel(scale):
    """Kernel with the scale baked in as a compile-time constant."""
    scale = float(scale)

    def kernel(x_ref, o_ref):
        x = x_ref[...]
        o_ref[...] = (x.astype(jnp.float32) * jnp.float32(scale)).astype(o_ref.dtype)

    return kernel


def _prefetch_scale_kernel(scale_ref, x_ref, o_ref):
    """Traced (learnable) lambda: scale prefetched once into SMEM, f32 math."""
    s = scale_ref[0]  # float32 scalar from SMEM
    o_ref[...] = (x_ref[...].astype(jnp.float32) * s).astype(o_ref.dtype)


def _choose_layout(n, itemsize):
    """Lane-dense (rows, lanes) slab and block_rows for an n-element tensor.

    Requires n % 128 == 0 (callers route ragged sizes to the jnp fallback).
    """
    # Sublane packing multiple for the dtype (f32: 8, bf16: 16, int8/fp8: 32).
    sub = max(8, 32 // itemsize)

    # Widest lane dim (multiple of 128) that divides n while keeping enough
    # rows to split into >= 2 row-aligned blocks.
    lanes = 128
    for cand in (2048, 1024, 512, 256, 128):
        if n % cand == 0 and n // cand >= 2 * sub:
            lanes = cand
            break
    rows = n // lanes

    if rows <= 2 * sub:
        # Too few rows to split usefully: one full-resident block.
        return lanes, rows, rows

    # ~4 MiB per block; with double-buffered in + out that's ~16 MiB live.
    max_block_rows = max(sub, (_BLOCK_BYTES // itemsize) // lanes)

    # Force >= 2 grid steps so the "parallel" axis actually shards across
    # v7x's two TensorCores (and writeback overlaps the next fetch).
    block_rows = min(max_block_rows, _cdiv(rows, 2))
    block_rows = max(sub, (block_rows // sub) * sub)
    block_rows = min(block_rows, rows)
    return lanes, rows, block_rows


def lambda_layer(x, init_lambda=1.0, base=1.0, *, in_place=False, force_kernel=False):
    """Forward of LambdaLayer: y = x * l if base == 1 else y = x * base ** l.

    `init_lambda` may be a static Python number (folded into the kernel as a
    constant) or a traced JAX scalar (learnable lambda, routed through scalar
    prefetch / SMEM). `base` is a static Python number, as in the module.
    `in_place=True` adds input_output_aliases (use only when x is donated).
    `force_kernel=True` forces the Pallas path even for tiny tensors (tests).
    """
    orig_shape = x.shape
    dtype = x.dtype
    n = x.size
    itemsize = jnp.dtype(dtype).itemsize

    static_scalar = isinstance(init_lambda, (int, float)) and not isinstance(
        init_lambda, bool
    )

    if static_scalar:
        scale = (
            float(init_lambda)
            if float(base) == 1.0
            else float(base) ** float(init_lambda)
        )
        if scale == 1.0:
            # Module default (init_lambda=1, base=1): pure identity. Skip the
            # whole read+write HBM pass and the kernel dispatch.
            return x
        scale_traced = None
    else:
        l = jnp.asarray(init_lambda, jnp.float32).reshape(())
        scale_traced = l if float(base) == 1.0 else jnp.float32(base) ** l
        scale = None

    small = n * itemsize < _MIN_PALLAS_BYTES
    ragged = (n % 128) != 0
    if n == 0 or ragged or (small and not force_kernel):
        # Tiny or non-lane-aligned tensors: a fused XLA multiply is strictly
        # cheaper (no dispatch / per-step overhead, no pad + tail-slice HBM
        # passes) and lets XLA fuse with producers/consumers.
        if static_scalar:
            return x * scale
        return (x.astype(jnp.float32) * scale_traced).astype(dtype)

    # NOTE: inputs are float feature maps (module multiplies by a FloatTensor);
    # integer dtypes would truncate through the f32 path.
    lanes, rows, block_rows = _choose_layout(n, itemsize)
    x2d = x.reshape(rows, lanes)  # contiguous -> free reshape

    grid = (_cdiv(rows, block_rows),)
    data_spec = pl.BlockSpec((block_rows, lanes), lambda i, *_: (i, 0))
    out_shape = jax.ShapeDtypeStruct((rows, lanes), dtype)
    compiler_params = pltpu.CompilerParams(
        dimension_semantics=("parallel",),
        vmem_limit_bytes=_VMEM_LIMIT_BYTES,
    )

    if static_scalar:
        out2d = pl.pallas_call(
            _make_const_scale_kernel(scale),
            out_shape=out_shape,
            grid_spec=pltpu.PrefetchScalarGridSpec(
                num_scalar_prefetch=0,
                grid=grid,
                in_specs=[data_spec],
                out_specs=data_spec,
            ),
            compiler_params=compiler_params,
            input_output_aliases=({0: 0} if in_place else {}),
        )(x2d)
    else:
        # Learnable / traced lambda: scalar prefetched into SMEM once before
        # the grid runs (no per-step scalar fetch).
        scale_vec = scale_traced.reshape(1).astype(jnp.float32)
        out2d = pl.pallas_call(
            _prefetch_scale_kernel,
            out_shape=out_shape,
            grid_spec=pltpu.PrefetchScalarGridSpec(
                num_scalar_prefetch=1,
                grid=grid,
                in_specs=[data_spec],
                out_specs=data_spec,
            ),
            compiler_params=compiler_params,
            input_output_aliases=({1: 0} if in_place else {}),
        )(scale_vec, x2d)

    return out2d.reshape(orig_shape)


if __name__ == "__main__":
    key = jax.random.PRNGKey(0)
    # Shape consistent with a conv feature map (NCHW): batch=2, C=4, 16x16.
    x = jax.random.normal(key, (2, 4, 16, 16), dtype=jnp.float32)

    # Default config (base == 1, init_lambda == 1): identity short-circuit.
    y1 = jax.block_until_ready(lambda_layer(x, init_lambda=1.0, base=1.0))
    assert jnp.allclose(y1, x, atol=1e-6)

    # Tiny-tensor fallback path (no kernel): y = x * init_lambda.
    y2 = jax.block_until_ready(lambda_layer(x, init_lambda=0.5, base=1.0))
    assert jnp.allclose(y2, x * 0.5, rtol=1e-6, atol=1e-6)

    # Pallas kernel, constant-folded scale: y = x * base ** init_lambda.
    y3 = jax.block_until_ready(
        lambda_layer(x, init_lambda=2.0, base=3.0, force_kernel=True)
    )
    assert jnp.allclose(y3, x * 9.0, rtol=1e-6, atol=1e-6)

    # Pallas kernel, learnable (traced) lambda via scalar prefetch.
    lam = jnp.float32(0.5)
    y4 = jax.block_until_ready(
        lambda_layer(x, init_lambda=lam, base=4.0, force_kernel=True)
    )
    assert jnp.allclose(y4, x * 2.0, rtol=1e-6, atol=1e-6)

    # bf16 input through the kernel: f32 math, bf16 store.
    xb = x.astype(jnp.bfloat16)
    y5 = jax.block_until_ready(
        lambda_layer(xb, init_lambda=1.0, base=2.0, force_kernel=True)
    )
    assert y5.dtype == jnp.bfloat16
    assert jnp.allclose(
        y5.astype(jnp.float32), xb.astype(jnp.float32) * 2.0, rtol=1e-2, atol=1e-2
    )

    # Larger tensor (256 KiB) that takes the multi-block Pallas path by default
    # (>= 2 parallel grid steps -> both v7x TensorCores get work).
    xl = jax.random.normal(jax.random.PRNGKey(1), (2, 16, 64, 64), dtype=jnp.float32)
    y6 = jax.block_until_ready(lambda_layer(xl, init_lambda=3.0, base=1.0))
    assert jnp.allclose(y6, xl * 3.0, rtol=1e-6, atol=1e-6)

    print("KERNEL_OK")
</pallas_src>

<mosaic_0001>
module attributes {stable_mosaic.version = 11 : i64} {
  func.func @kernel(%arg0: i32, %arg1: memref<16x128xf32, #tpu.memory_space<vmem>>, %arg2: memref<16x128xf32, #tpu.memory_space<vmem>>) attributes {dimension_semantics = [#tpu.dimension_semantics<parallel>], iteration_bounds = array<i64: 1>, scalar_prefetch = 0 : i64, scratch_operands = 0 : i64, tpu.core_type = #tpu.core_type<tc>, window_params = [{transform_indices = @transform_0, window_bounds = array<i64: 16, 128>}, {transform_indices = @transform_1, window_bounds = array<i64: 16, 128>}]} {
    %c0 = arith.constant 0 : index
    %c0_0 = arith.constant 0 : index
    %0 = vector.load %arg1[%c0, %c0_0] : memref<16x128xf32, #tpu.memory_space<vmem>>, vector<16x128xf32>
    %cst = arith.constant 9.000000e+00 : f32
    %1 = vector.broadcast %cst : f32 to vector<16x128xf32>
    %2 = arith.mulf %0, %1 : vector<16x128xf32>
    %c0_1 = arith.constant 0 : index
    %c0_2 = arith.constant 0 : index
    %3 = vector.load %arg2[%c0_1, %c0_2] : memref<16x128xf32, #tpu.memory_space<vmem>>, vector<16x128xf32>
    tpu.vector_store %arg2[%c0_1, %c0_2], %2 {strides = array<i32>} : memref<16x128xf32, #tpu.memory_space<vmem>>, vector<16x128xf32>,
    return
  }
  func.func @transform_0(%arg0: i32) -> (i32, i32) {
    %c0_i32 = arith.constant 0 : i32
    %c0_i32_0 = arith.constant 0 : i32
    return %arg0, %c0_i32 : i32, i32
  }
  func.func @transform_1(%arg0: i32) -> (i32, i32) {
    %c0_i32 = arith.constant 0 : i32
    %c0_i32_0 = arith.constant 0 : i32
    return %arg0, %c0_i32 : i32, i32
  }
}

</mosaic_0001>

<bundles_post_ra>
// kernel: tpu_custom_call.1
= control target key start
LH: loop header
LB: loop body
LE: loop exit
PB: predicated region body
PF: predicated region fallthrough
CT: control target
= control target key end

     0   :  { %6 = vsyncpa [#allocation3], 0  ;;  %s126_s0 = inlined_call_operand.hbm [shape: f32[16,128], index: 0, kind: input, shape index: {}]   ;;  %s127_s1 = inlined_call_operand.hbm [shape: f32[16,128], index: 1, kind: output, shape index: {}]  }
   0x1   :  { %7 = vsyncpa [#allocation4], 0  ;;  %s12_s8 = sshll.u32 %s126_s0, 4  ;;  %s106_s9 = smov [#allocation2]   ;;  %s13_s8 = int_to_ptr.hbm [resolvable:$true] %s12_s8 }
   0x2   :  { %s14_s10 = sshll.u32 %s106_s9, 4  ;;  %s107_s11 = smov 128   ;;  %s15_s10 = int_to_ptr.vmem [resolvable:$true] %s14_s10 }
   0x3   :  { %s108_s12 = smov 8  }
   0x4   :  { %20 = dma.hbm_to_vmem [thread:$0]  %s13_s8, 256, %s15_s10, [#allocation3], %s107_s11, %s107_s11, %s108_s12  }
   0x5   :  { %102 = dma.done.wait [#allocation3], 256  }
   0x6   :  { %103 = vsyncadd [#allocation3], 4294967040  ;;  %s109_s13 = smov [#allocation5]   ;;  %s37_s17 = sshll.u32 %s127_s1, 4  ;;  %v25_v0 = vld [vmem:[#allocation2] sm:$0xff]  ;;  %v26_v1 = vld [vmem:[#allocation2 + $0x8] sm:$0xff]  ;;  %s38_s17 = int_to_ptr.hbm [resolvable:$true] %s37_s17 }
   0x7   :  { %s35_s14 = sshll.u32 %s109_s13, 4  ;;  %v27_v2 = vmul.f32 9.0, %v25_v0  ;;  %v28_v3 = vmul.f32 9.0, %v26_v1  ;;  %s36_s14 = int_to_ptr.vmem [resolvable:$true] %s35_s14 }
   0x9   :  { %29 = vst [vmem:[#allocation5] sm:$0xff] %v27_v2 }
   0xa   :  { %30 = vst [vmem:[#allocation5 + $0x8] sm:$0xff] %v28_v3 }
   0xb   :  { %43 = dma.vmem_to_hbm [thread:$0]  %s36_s14, 256, %s38_s17, [#allocation4], %s107_s11, %s107_s11, %s108_s12  }
   0xc   :  { %104 = dma.done.wait [#allocation4], 256  }
   0xd   :  { %105 = vsyncadd [#allocation4], 4294967040 }
   0xe   :  { %48 = vsyncpa [#allocation3], 1 }
   0xf   :  { %49 = vsyncpa [#allocation4], 1 }

</bundles_post_ra>
